<compile_context>
chip_gen: v7x
topology: tpu7x:2x2x1
jax: 0.10.0
libtpu: 0.0.40
codegen_flags: <defaults>
</compile_context>

<pallas_src>
import functools

import jax
import jax.numpy as jnp
from jax.experimental import pallas as pl
from jax.experimental.pallas import tpu as pltpu

GAMMA = 1.5
ALPHA = 0.25
LANES = 128
SUBLANES = 8
DEFAULT_BLOCK_ROWS = 2048            # (2048, 128) f32 tile = 1 MiB per input per buffer
VMEM_LIMIT_BYTES = 48 * 1024 * 1024  # > v5e's 16 MiB scoped default, < v7x's 64 MiB/TC


def _round_up(a, b):
    return ((a + b - 1) // b) * b


def _focal_kernel(pred_ref, true_ref, out_ref, *, gamma, alpha, rows_rem):
    x = pred_ref[...].astype(jnp.float32)
    y = true_ref[...].astype(jnp.float32)

    # Shared transcendental: e = exp(-|x|) feeds both the stable BCE and the sigmoid.
    e = jnp.exp(-jnp.abs(x))

    # Numerically stable BCE-with-logits: max(x,0) - x*y + log1p(exp(-|x|))
    bce = jnp.maximum(x, 0.0) - x * y + jnp.log1p(e)

    # Sigmoid pieces from e and one EUP approx reciprocal (no full-precision divide):
    #   x >= 0:  p = 1/(1+e),   1-p = e/(1+e)
    #   x <  0:  p = e/(1+e),   1-p = 1/(1+e)
    inv = pl.reciprocal(1.0 + e, approx=True)
    ei = e * inv
    nonneg = x >= 0.0
    p = jnp.where(nonneg, inv, ei)
    one_minus_p = jnp.where(nonneg, ei, inv)

    # m = 1 - p_t = y*(1-p) + (1-y)*p, computed directly (p_t never formed).
    m = p + y * (one_minus_p - p)

    # alpha_factor = y*alpha + (1-y)*(1-alpha) = (2*alpha-1)*y + (1-alpha), consts folded.
    af = (2.0 * alpha - 1.0) * y + (1.0 - alpha)

    if gamma == 1.5:
        modulating = m * jnp.sqrt(m)     # one EUP sqrt instead of a generic pow (log+exp)
    elif gamma == 2.0:
        modulating = m * m
    elif gamma == 1.0:
        modulating = m
    else:
        modulating = jnp.power(m, gamma)

    loss = bce * (af * modulating)

    def write_partial(vals):
        # (block_rows, 128) -> (block_rows/8, 8, 128) is a tile-aligned no-op reshape;
        # the axis-0 sum is pure VPU vreg adds (no cross-lane XLU reduce, no (1,1) RMW).
        br = vals.shape[0]
        partial = vals.reshape(br // SUBLANES, SUBLANES, LANES).sum(axis=0)
        out_ref[...] = partial.reshape(1, SUBLANES, LANES)

    if rows_rem:  # static: last block is ragged -> only it pays the row mask
        last = pl.num_programs(0) - 1

        @pl.when(pl.program_id(0) != last)
        def _():
            write_partial(loss)

        @pl.when(pl.program_id(0) == last)
        def _():
            # Rows beyond the array edge hold garbage (possibly NaN); select them to 0.
            row = jax.lax.broadcasted_iota(jnp.int32, loss.shape, 0)
            write_partial(jnp.where(row < rows_rem, loss, 0.0))
    else:
        write_partial(loss)


def focal_loss(pred, true, gamma=GAMMA, alpha=ALPHA, block_rows=DEFAULT_BLOCK_ROWS):
    """Focal loss (BCE-with-logits base, reduction='mean') for arbitrary-shaped inputs."""
    assert pred.shape == true.shape
    n = pred.size

    pred_flat = pred.reshape(-1)
    true_flat = true.reshape(-1)

    # Lane remainder: pad to a multiple of 128 (and at least one (8,128) tile) with
    # (pred=+100, true=1), whose focal loss is exactly 0 -> no in-kernel mask and no
    # wrapper-side correction for these elements.
    # TODO(synk): when n % 128 != 0 this pad is still one extra HBM pass over the inputs;
    #             a fully pad-free path would need a 1-D-block kernel over the raw flat
    #             array. Lane-aligned inputs (the common case) take the pad-free path.
    padded_len = max(_round_up(n, LANES), SUBLANES * LANES)
    lane_pad = padded_len - n
    if lane_pad:
        pred_flat = jnp.pad(pred_flat, (0, lane_pad), constant_values=100.0)
        true_flat = jnp.pad(true_flat, (0, lane_pad), constant_values=1.0)

    rows = padded_len // LANES
    # No wrapper-side dtype cast: bf16 inputs stay bf16 over HBM; kernel upcasts on VPU.
    pred2d = pred_flat.reshape(rows, LANES)
    true2d = true_flat.reshape(rows, LANES)

    # Block-rows selection: big tiles for HBM-roofline efficiency, but split small /
    # small-odd-count cases into an even number (>=2) of blocks so the "parallel" grid
    # load-balances across both v7x TensorCores.
    nb = pl.cdiv(rows, block_rows)
    if nb <= 1:
        nb_target = 2 if rows > SUBLANES else 1
    elif nb % 2 == 1 and nb <= 8:
        nb_target = nb + 1
    else:
        nb_target = nb
    br = min(block_rows, _round_up(pl.cdiv(rows, nb_target), SUBLANES))
    num_blocks = pl.cdiv(rows, br)
    rows_rem = rows % br  # valid rows in the (possibly ragged) last block; 0 => full

    kernel = functools.partial(_focal_kernel, gamma=gamma, alpha=alpha,
                               rows_rem=rows_rem)

    partials = pl.pallas_call(
        kernel,
        out_shape=jax.ShapeDtypeStruct((num_blocks, SUBLANES, LANES), jnp.float32),
        grid_spec=pltpu.PrefetchScalarGridSpec(
            num_scalar_prefetch=0,
            grid=(num_blocks,),
            in_specs=[
                pl.BlockSpec((br, LANES), lambda i: (i, 0)),
                pl.BlockSpec((br, LANES), lambda i: (i, 0)),
            ],
            out_specs=pl.BlockSpec((1, SUBLANES, LANES), lambda i: (i, 0, 0)),
        ),
        compiler_params=pltpu.CompilerParams(
            dimension_semantics=("parallel",),   # shards across v7x's 2 TensorCores
            vmem_limit_bytes=VMEM_LIMIT_BYTES,
        ),
    )(pred2d, true2d)

    # Final tiny reduction + mean in the wrapper (kernel emits lane-dense partials).
    return jnp.sum(partials) / n


def _reference(pred, true, gamma=GAMMA, alpha=ALPHA):
    """Pure-JAX mirror of the PyTorch FocalLoss forward (BCEWithLogitsLoss base, mean)."""
    x = pred.astype(jnp.float32)
    y = true.astype(jnp.float32)
    bce = jnp.maximum(x, 0.0) - x * y + jnp.log1p(jnp.exp(-jnp.abs(x)))
    p = jax.nn.sigmoid(x)
    p_t = y * p + (1.0 - y) * (1.0 - p)
    alpha_factor = y * alpha + (1.0 - y) * (1.0 - alpha)
    modulating = jnp.power(1.0 - p_t, gamma)
    return jnp.mean(bce * alpha_factor * modulating)


if __name__ == "__main__":
    key = jax.random.PRNGKey(0)
    k1, k2, k3, k4, k5, k6 = jax.random.split(key, 6)

    # Tolerances are loosened slightly relative to exact-divide math because the kernel
    # uses the EUP approximate reciprocal for the sigmoid (per the perf review).
    RTOL, ATOL = 5e-3, 1e-5

    # Case 1: lane-aligned NCHW input (2048 elements == 16 full lane rows, no padding).
    pred = jax.random.normal(k1, (2, 4, 16, 16), dtype=jnp.float32)
    true = jax.random.uniform(k2, (2, 4, 16, 16), dtype=jnp.float32)
    true = jnp.where(true < 0.5, 0.0, true)   # exercise y==0 and soft y>0 targets
    out = focal_loss(pred, true)
    jax.block_until_ready(out)
    ref = _reference(pred, true)
    assert jnp.allclose(out, ref, rtol=RTOL, atol=ATOL), (out, ref)

    # Case 2: non-128-aligned element count (1938) -> zero-loss lane-padding path.
    pred2 = jax.random.normal(k3, (2, 3, 17, 19), dtype=jnp.float32)
    true2 = (jax.random.uniform(k4, (2, 3, 17, 19)) > 0.5).astype(jnp.float32)
    out2 = focal_loss(pred2, true2)
    jax.block_until_ready(out2)
    ref2 = _reference(pred2, true2)
    assert jnp.allclose(out2, ref2, rtol=RTOL, atol=ATOL), (out2, ref2)

    # Case 3: ragged last grid block (rows=10, block_rows=8) -> pl.when row-mask path.
    pred3 = jax.random.normal(k5, (3, 5, 7, 11), dtype=jnp.float32)
    true3 = (jax.random.uniform(k6, (3, 5, 7, 11)) > 0.5).astype(jnp.float32)
    out3 = focal_loss(pred3, true3)
    jax.block_until_ready(out3)
    ref3 = _reference(pred3, true3)
    assert jnp.allclose(out3, ref3, rtol=RTOL, atol=ATOL), (out3, ref3)

    print("KERNEL_OK")
</pallas_src>

<mosaic_0001>
module attributes {stable_mosaic.version = 11 : i64} {
  func.func @_focal_kernel(%arg0: i32, %arg1: memref<8x128xf32, #tpu.memory_space<vmem>>, %arg2: memref<8x128xf32, #tpu.memory_space<vmem>>, %arg3: memref<1x8x128xf32, #tpu.memory_space<vmem>>) attributes {dimension_semantics = [#tpu.dimension_semantics<parallel>], iteration_bounds = array<i64: 2>, scalar_prefetch = 0 : i64, scratch_operands = 0 : i64, tpu.core_type = #tpu.core_type<tc>, window_params = [{transform_indices = @transform_0, window_bounds = array<i64: 8, 128>}, {transform_indices = @transform_1, window_bounds = array<i64: 8, 128>}, {transform_indices = @transform_2, window_bounds = array<i64: 1, 8, 128>}]} {
    %c0 = arith.constant 0 : index
    %c0_0 = arith.constant 0 : index
    %0 = vector.load %arg1[%c0, %c0_0] : memref<8x128xf32, #tpu.memory_space<vmem>>, vector<8x128xf32>
    %c0_1 = arith.constant 0 : index
    %c0_2 = arith.constant 0 : index
    %1 = vector.load %arg2[%c0_1, %c0_2] : memref<8x128xf32, #tpu.memory_space<vmem>>, vector<8x128xf32>
    %2 = math.absf %0 : vector<8x128xf32>
    %cst = arith.constant 0.000000e+00 : f32
    %3 = vector.broadcast %cst : f32 to vector<8x128xf32>
    %4 = arith.subf %3, %2 : vector<8x128xf32>
    %5 = math.exp %4 : vector<8x128xf32>
    %cst_3 = arith.constant 0.000000e+00 : f32
    %6 = vector.broadcast %cst_3 : f32 to vector<8x128xf32>
    %7 = arith.maximumf %0, %6 : vector<8x128xf32>
    %8 = arith.mulf %0, %1 : vector<8x128xf32>
    %9 = arith.subf %7, %8 : vector<8x128xf32>
    %10 = math.log1p %5 : vector<8x128xf32>
    %11 = arith.addf %9, %10 : vector<8x128xf32>
    %cst_4 = arith.constant 1.000000e+00 : f32
    %12 = vector.broadcast %cst_4 : f32 to vector<8x128xf32>
    %13 = arith.addf %12, %5 : vector<8x128xf32>
    %14 = tpu.reciprocal %13 {approx = true} : vector<8x128xf32> -> vector<8x128xf32>
    %15 = arith.mulf %5, %14 : vector<8x128xf32>
    %cst_5 = arith.constant 0.000000e+00 : f32
    %16 = vector.broadcast %cst_5 : f32 to vector<8x128xf32>
    %17 = arith.cmpf oge, %0, %16 : vector<8x128xf32>
    %18 = arith.select %17, %14, %15 : vector<8x128xi1>, vector<8x128xf32>
    %19 = arith.select %17, %15, %14 : vector<8x128xi1>, vector<8x128xf32>
    %20 = arith.subf %19, %18 : vector<8x128xf32>
    %21 = arith.mulf %1, %20 : vector<8x128xf32>
    %22 = arith.addf %18, %21 : vector<8x128xf32>
    %cst_6 = arith.constant -5.000000e-01 : f32
    %23 = vector.broadcast %cst_6 : f32 to vector<8x128xf32>
    %24 = arith.mulf %23, %1 : vector<8x128xf32>
    %cst_7 = arith.constant 7.500000e-01 : f32
    %25 = vector.broadcast %cst_7 : f32 to vector<8x128xf32>
    %26 = arith.addf %24, %25 : vector<8x128xf32>
    %27 = math.sqrt %22 : vector<8x128xf32>
    %28 = arith.mulf %22, %27 : vector<8x128xf32>
    %29 = arith.mulf %26, %28 : vector<8x128xf32>
    %30 = arith.mulf %11, %29 : vector<8x128xf32>
    %31 = vector.shape_cast %30 : vector<8x128xf32> to vector<1x8x128xf32>
    %cst_8 = arith.constant dense<0.000000e+00> : vector<8x128xf32>
    %32 = vector.multi_reduction <add>, %31, %cst_8 [0] : vector<1x8x128xf32> to vector<8x128xf32>
    %33 = vector.shape_cast %32 : vector<8x128xf32> to vector<1x8x128xf32>
    %c0_9 = arith.constant 0 : index
    %c0_10 = arith.constant 0 : index
    %c0_11 = arith.constant 0 : index
    %34 = vector.load %arg3[%c0_9, %c0_10, %c0_11] : memref<1x8x128xf32, #tpu.memory_space<vmem>>, vector<1x8x128xf32>
    tpu.vector_store %arg3[%c0_9, %c0_10, %c0_11], %33 {strides = array<i32>} : memref<1x8x128xf32, #tpu.memory_space<vmem>>, vector<1x8x128xf32>,
    return
  }
  func.func @transform_0(%arg0: i32) -> (i32, i32) {
    %c0_i32 = arith.constant 0 : i32
    %c0_i32_0 = arith.constant 0 : i32
    return %arg0, %c0_i32 : i32, i32
  }
  func.func @transform_1(%arg0: i32) -> (i32, i32) {
    %c0_i32 = arith.constant 0 : i32
    %c0_i32_0 = arith.constant 0 : i32
    return %arg0, %c0_i32 : i32, i32
  }
  func.func @transform_2(%arg0: i32) -> (i32, i32, i32) {
    %c0_i32 = arith.constant 0 : i32
    %c0_i32_0 = arith.constant 0 : i32
    %c0_i32_1 = arith.constant 0 : i32
    return %arg0, %c0_i32, %c0_i32_0 : i32, i32, i32
  }
}

</mosaic_0001>

<bundles_post_ra>
// kernel: tpu_custom_call.1
= control target key start
LH: loop header
LB: loop body
LE: loop exit
PB: predicated region body
PF: predicated region fallthrough
CT: control target
= control target key end

     0   :  { %7 = vsyncpa [#allocation3], 0  ;;  %s783_s0 = inlined_call_operand.hbm [shape: f32[16,128], index: 0, kind: input, shape index: {}]   ;;  %s784_s1 = inlined_call_operand.hbm [shape: f32[16,128], index: 1, kind: input, shape index: {}]   ;;  %s785_s2 = inlined_call_operand.hbm [shape: f32[2,8,128], index: 2, kind: output, shape index: {}]  }
   0x1   :  { %9 = vsyncpa [#allocation3 + $0x1], 0 }
   0x2   :  { %10 = vsyncpa [#allocation6], 0 }
   0x3   :  { %12 = vsyncpa [#allocation6 + $0x1], 0 }
   0x4   :  { %13 = vsyncpa [#allocation4], 0 }
   0x5   :  { %15 = vsyncpa [#allocation4 + $0x1], 0  ;;  %s569_s9 = smov 0   ;;  %s571_s10 = smov 0  }
   0x6   :  { %s573_s11 = smov 0   ;;  %s575_s12 = smov 0  }
   0x7 LB: > { %s590_s13 = sadd.s32 4294967295, %s549_s12   ;;  %s345_s14 = sadd.s32 4294967294, %s549_s12   ;;  %s549_s12 = sphi %s575_s12, %s804_s12   ;;  %s545_s11 = sphi %s573_s11, %s803_s11   ;;  %s541_s10 = sphi %s571_s10, %s802_s10   ;;  %s537_s9 = sphi %s569_s9, %s801_s9  }
   0x8   : > { %s594_s15 = sadd.s32 1, %s549_s12   ;;  %s28_s16 = sadd.s32 1, %s545_s11 }
   0x9   : > { %s25_s17 = ssub.s32 %s549_s12, %s594_s15  ;;  %p35_p0 = scmp.ne.s32.totalorder %s545_s11, %s541_s10 }
   0xa   : > { %p26_p1 = scmp.eq.s32.totalorder %s25_s17, 0  ;;  %p36_p2 = scmp.eq.s32.totalorder %s549_s12, 0 }
   0xb   : > { %p41_p3 = scmp.ne.s32.totalorder %s541_s10, %s537_s9  ;;  %p42_p4 = scmp.eq.s32.totalorder %s590_s13, 0 }
   0xc   : > { %s606_s18 = scalar_select %p26_p1, %s545_s11, %s28_s16  }
   0xd   : > { %p608_p5 = por %p36_p2, %p35_p0  ;;  %p612_p6 = por %p42_p4, %p41_p3 }
   0xe   : > { %p91_p7 = scmp.eq.s32.totalorder %s590_s13, 1  ;;  %p97_p8 = scmp.eq.s32.totalorder %s345_s14, 1 }
   0xf   : > { %s789_s20 = scalar_select %p612_p6, 1, 0 }
  0x10   : > { %p377_p10 = scmp.lt.s32.totalorder %s549_s12, 2  ;;  %p619_p11 = por %p91_p7, %p35_p0 }
  0x11   : > { %p623_p12 = por %p97_p8, %p41_p3  ;;  %s628_s23 = sand.u32 1, %s545_s11  }
  0x12   : > { %s790_s21 = scalar_select %p619_p11, 1, 0 }
  0x13   : > { %s791_s22 = scalar_select %p623_p12, 1, 0 }
  0x14   : > { %s349_s24 = sshll.u32 %s549_s12, 7  ;;  %s348_s25 = sshll.u32 %s628_s23, 3 }
  0x15   : > { %s637_s28 = scalar_lea.hbm %s783_s0, %s349_s24  ;;  %s121_s29 = scalar_lea.vmem [#allocation2], %s348_s25 }
  0x16   : > { %s128_s30 = sshll.u32 %s121_s29, 4  ;;  %p643_p13 = pnand %p377_p10, %p608_p5  ;;  %s647_s30 = int_to_ptr.vmem [resolvable:$true] %s128_s30 }
  0x17   : > { %s118_s4 = scalar_lea.sflag [#allocation3], %s628_s23  ;;  %s419_s5 = scalar_lea.hbm %s637_s28, 128 }
  0x18   : > { %p420_p2 = scmp.ne.s32.totalorder %s637_s28, %s419_s5  ;;  %p421_p3 = pneg %p643_p13 }
  0x19   : > { %s424_s8 = scalar_lea.hbm %s783_s0, 256  ;;  %p425_p5 = scmp.lt.u32.totalorder %s637_s28, %s783_s0 }
  0x1a   : > { %p422_p4 = pnand %p421_p3, %p420_p2  ;;  %p426_p8 = scmp.lt.u32.totalorder %s424_s8, %s419_s5 }
  0x1b   : > { %p428_p9 = scmp.lt.u32.totalorder %s419_s5, %s637_s28 }
  0x1c   : > { %p423_p7 = pneg %p422_p4  ;;  %p427_p10 = por %p426_p8, %p425_p5 }
  0x1e   : > { %p429_p0 = por %p428_p9, %p427_p10 }
  0x20   : > { %p430_p1 = pnand %p429_p0, %p423_p7 }
  0x22   : > { %433 = shalt.err (!%p430_p1)
}
  0x23   : > { %s434_s17 = scalar_lea.vmem %s647_s30, 128  ;;  %s551_s19 = smov [#allocation2]  }
  0x24   : > { %p435_p2 = scmp.ne.s32.totalorder %s647_s30, %s434_s17  ;;  %s439_s26 = sshll.u32 %s551_s19, 4  ;;  %s440_s26 = int_to_ptr.vmem [resolvable:$false] %s439_s26 }
  0x25   : > { %s441_s27 = scalar_lea.vmem %s440_s26, 256  ;;  %p442_p11 = scmp.lt.s32.totalorder %s647_s30, %s440_s26 }
  0x26   : > { %p437_p4 = pnand %p435_p2, %p421_p3  ;;  %p443_p5 = scmp.lt.s32.totalorder %s441_s27, %s434_s17 }
  0x28   : > { %p438_p12 = pneg %p437_p4  ;;  %p444_p8 = por %p443_p5, %p442_p11 }
  0x2a   : > { %p445_p9 = pnand %p444_p8, %p438_p12 }
  0x2c   : > { %448 = shalt.err (!%p445_p9)
}
  0x2d   : > { %369 = dma.hbm_to_vmem [thread:$0]  (!%p643_p13), %s637_s28, 128, %s647_s30, %s118_s4  }
  0x2e   : > { %p793_p0 = scmp.lt.s32.totalorder %s549_s12, 3  ;;  %p794_p1 = scmp.ge.s32.totalorder %s549_s12, 1 }
  0x2f   : > { %s690_s7 = scalar_lea.hbm %s784_s1, %s349_s24  ;;  %s139_s8 = scalar_lea.vmem [#allocation5], %s348_s25 }
  0x30   : > { %p681_p7 = pnand %p794_p1, %p793_p0  ;;  %s146_s14 = sshll.u32 %s139_s8, 4  ;;  %s147_s14 = int_to_ptr.vmem [resolvable:$true] %s146_s14 }
  0x31   : > { %s136_s28 = scalar_lea.sflag [#allocation6], %s628_s23  ;;  %s449_s30 = scalar_lea.hbm %s690_s7, 128 }
  0x32   : > { %s795_s29 = scalar_select %p681_p7, 1, 0 }
  0x33   : > { %p450_p11 = scmp.ne.s32.totalorder %s690_s7, %s449_s30  ;;  %s454_s24 = scalar_lea.hbm %s784_s1, 256 }
  0x34   : > { %p455_p2 = scmp.lt.u32.totalorder %s690_s7, %s784_s1  ;;  %p456_p4 = scmp.lt.u32.totalorder %s454_s24, %s449_s30 }
  0x35   : > { %p452_p12 = pnand %p450_p11, %p421_p3  ;;  %p458_p8 = scmp.lt.u32.totalorder %s449_s30, %s690_s7 }
  0x36   : > { %p457_p5 = por %p456_p4, %p455_p2 }
  0x37   : > { %p453_p10 = pneg %p452_p12 }
  0x38   : > { %p459_p9 = por %p458_p8, %p457_p5 }
  0x3a   : > { %p460_p0 = pnand %p459_p9, %p453_p10 }
  0x3c   : > { %463 = shalt.err (!%p460_p0)
}
  0x3d   : > { %s464_s23 = scalar_lea.vmem %s147_s14, 128  ;;  %s552_s25 = smov [#allocation5]  }
  0x3e   : > { %p465_p1 = scmp.ne.s32.totalorder %s147_s14, %s464_s23  ;;  %s469_s26 = sshll.u32 %s552_s25, 4  ;;  %s470_s26 = int_to_ptr.vmem [resolvable:$false] %s469_s26 }
  0x3f   : > { %s471_s27 = scalar_lea.vmem %s470_s26, 256  ;;  %p472_p6 = scmp.lt.s32.totalorder %s147_s14, %s470_s26 }
  0x40   : > { %p467_p11 = pnand %p465_p1, %p421_p3  ;;  %p473_p7 = scmp.lt.s32.totalorder %s471_s27, %s464_s23 }
  0x42   : > { %p468_p12 = pneg %p467_p11  ;;  %p474_p2 = por %p473_p7, %p472_p6 }
  0x44   : > { %p475_p4 = pnand %p474_p2, %p468_p12 }
  0x46   : > { %478 = shalt.err (!%p475_p4)
}
  0x47   : > { %372 = dma.hbm_to_vmem [thread:$0]  (!%p643_p13), %s690_s7, 128, %s147_s14, %s136_s28  }
  0x48   : > { %p796_p10 = scmp.ne.s32.totalorder %s795_s29, 0 }
  0x49   : > { %s717_s5 = sand.u32 (!%p796_p10), 1, %s541_s10   ;;  %p797_p6 = scmp.ne.s32.totalorder (!%p796_p10), %s789_s20, 0 }
  0x4a   : > { %155 = sbr.rel (%p796_p10) target bundleno = 159 (0x9f), region = 28  ;;  %s720_s6 = sshll.u32 (!%p796_p10), %s717_s5, 3 }
  0x4b   : > { %s158_s8 = scalar_lea.sflag (!%p796_p10), [#allocation3], %s717_s5  ;;  %s161_s30 = scalar_lea.vmem (!%p796_p10), [#allocation2], %s720_s6 }
  0x51   : > { %524 = dma.done.wait (%p797_p6), %s158_s8, 128  }
  0x52   : > { %526 = vsyncadd (%p797_p6), %s158_s8, 4294967168  ;;  %s167_s3 = scalar_lea.sflag [#allocation6], %s717_s5  ;;  %s170_s29 = scalar_lea.vmem [#allocation5], %s720_s6 }
  0x53   : > { %528 = dma.done.wait (%p797_p6), %s167_s3, 128  }
  0x54   : > { %530 = vsyncadd (%p797_p6), %s167_s3, 4294967168  ;;  %v196_v0 = vld [vmem:[%s161_s30] sm:$0xff]  ;;  %v197_v8 = vld [vmem:[%s170_s29] sm:$0xff]  ;;  %s195_s20 = scalar_lea.vmem [#allocation7], %s720_s6  ;;  %s357_s14 = sshll.u32 %s590_s13, 7 }
  0x55   : > { %v198_v1 = vand.u32 2147483647, %v196_v0  ;;  %vm218_vm0 = vcmp.ge.f32.partialorder %v196_v0, 0.0  ;;  %v202_v18 = vmax.f32 %v196_v0, 0.0  ;;  %v203_v19 = vmul.f32 %v197_v8, %v196_v0  ;;  %s252_s7 = sshll.u32 %s195_s20, 4  ;;  %s741_s16 = scalar_lea.hbm %s785_s2, %s357_s14  ;;  %s736_s7 = int_to_ptr.vmem [resolvable:$true] %s252_s7 }
  0x56   : > { %v224_v22 = vmul.f32 -0.5, %v197_v8  ;;  %s239_s24 = scalar_lea.sflag [#allocation4], %s717_s5  ;;  %s479_s17 = scalar_lea.vmem %s736_s7, 128 }
  0x57   : > { %v199_v2 = vsub.f32 0.0, %v198_v1  ;;  %v204_v25 = vsub.f32 %v202_v18, %v203_v19  ;;  %p480_p13 = scmp.ne.s32.totalorder %s736_s7, %s479_s17  ;;  %p798_p3 = scmp.ne.s32.totalorder %s790_s21, 0 }
  0x58   : > { %v225_v28 = vadd.f32 0.75, %v224_v22  ;;  %s553_s13 = smov [#allocation7]  }
  0x59   : > { %v200_v3 = vmul.f32 1.442695, %v199_v2  ;;  %p481_p7 = pnand %p480_p13, %p798_p3  ;;  %s483_s19 = sshll.u32 %s553_s13, 4  ;;  %s484_s19 = int_to_ptr.vmem [resolvable:$false] %s483_s19 }
  0x5a   : > { %s485_s23 = scalar_lea.vmem %s484_s19, 256  ;;  %p486_p8 = scmp.lt.s32.totalorder %s736_s7, %s484_s19 }
  0x5b   : > { %411 = vpow2.f32 %v200_v3  ;;  %p482_p5 = pneg %p481_p7  ;;  %p487_p9 = scmp.lt.s32.totalorder %s485_s23, %s479_s17 }
  0x5d   : > { %p488_p0 = por %p487_p9, %p486_p8 }
  0x5f   : > { %p489_p1 = pnand %p488_p0, %p482_p5 }
  0x65   : > { %v412_v4 = vpop.eup %411 }
  0x66   : > { %v205_v5 = vadd.f32 1.0, %v412_v4  ;;  %v208_v14 = vmul.f32 -0.5, %v412_v4  ;;  %v211_v17 = vand.u32 2147483647, %v412_v4 }
  0x68   : > { %413 = vrcp.f32 %v205_v5  ;;  %v209_v15 = vadd.f32 1.0, %v208_v14  ;;  %vm212_vm1 = vcmp.lt.f32.partialorder %v211_v17, 0.0004427343 }
  0x69   : > { %415 = vlog2.f32 %v205_v5 }
  0x6a   : > { %v210_v21 = vmul.f32 %v412_v4, %v209_v15 }
  0x72   : > { %v414_v6 = vpop.eup %413 }
  0x73   : > { %v217_v7 = vmul.f32 %v414_v6, %v412_v4  ;;  %v416_v16 = vpop.eup %415 }
  0x74   : > { %v207_v20 = vmul.f32 0.6931472, %v416_v16 }
  0x75   : > { %v219_v9 = vsel %vm218_vm0, %v414_v6, %v217_v7  ;;  %v220_v10 = vsel %vm218_vm0, %v217_v7, %v414_v6 }
  0x76   : > { %v221_v11 = vsub.f32 %v220_v10, %v219_v9  ;;  %v213_v27 = vsel %vm212_vm1, %v210_v21, %v207_v20 }
  0x77   : > { %v214_v31 = vadd.f32 %v213_v27, %v204_v25 }
  0x78   : > { %v222_v12 = vmul.f32 %v221_v11, %v197_v8 }
  0x7a   : > { %v223_v13 = vadd.f32 %v222_v12, %v219_v9 }
  0x7c   : > { %417 = vrsqrt.f32 %v223_v13  ;;  %vm228_vm2 = vcmp.eq.f32.partialorder %v223_v13, inf  ;;  %v231_v24 = vand.u32 2147483648, %v223_v13  ;;  %vm230_vm3 = vcmp.eq.f32.partialorder %v223_v13, 0.0 }
  0x86   : > { %v418_v23 = vpop.eup %417 }
  0x87   : > { %v227_v26 = vmul.f32 %v418_v23, %v223_v13 }
  0x89   : > { %v229_v29 = vsel %vm228_vm2, %v223_v13, %v227_v26 }
  0x8a   : > { %v232_v30 = vsel %vm230_vm3, %v231_v24, %v229_v29 }
  0x8b   : > { %v233_v32 = vmul.f32 %v232_v30, %v223_v13 }
  0x8d   : > { %v234_v33 = vmul.f32 %v233_v32, %v225_v28 }
  0x8f   : > { %v235_v34 = vmul.f32 %v234_v33, %v214_v31 }
  0x91   : > { %237 = vst [vmem:[%s195_s20] sm:$0xff] %v235_v34 }
  0x92   : > { %492 = shalt.err (!%p489_p1)
}
  0x93   : > { %s493_s25 = scalar_lea.hbm %s741_s16, 128  ;;  %s497_s5 = scalar_lea.hbm %s785_s2, 256 }
  0x94   : > { %p494_p11 = scmp.ne.s32.totalorder %s741_s16, %s493_s25  ;;  %p498_p4 = scmp.lt.u32.totalorder %s741_s16, %s785_s2 }
  0x95   : > { %p499_p10 = scmp.lt.u32.totalorder %s497_s5, %s493_s25  ;;  %p501_p13 = scmp.lt.u32.totalorder %s493_s25, %s741_s16 }
  0x96   : > { %p495_p12 = pnand %p494_p11, %p798_p3 }
  0x97   : > { %p500_p6 = por %p499_p10, %p498_p4 }
  0x98   : > { %p496_p2 = pneg %p495_p12 }
  0x99   : > { %p502_p7 = por %p501_p13, %p500_p6 }
  0x9b   : > { %p503_p5 = pnand %p502_p7, %p496_p2 }
  0x9d   : > { %506 = shalt.err (!%p503_p5)
}
  0x9e   : > { %364 = dma.vmem_to_hbm [thread:$0]  (%p798_p3), %s736_s7, 128, %s741_s16, %s239_s24  }
  0x9f PF: > { %s264_s30 = sand.u32 1, %s537_s9   ;;  %p799_p8 = scmp.ne.s32.totalorder %s791_s22, 0 }
  0xa0   : > { %p800_p9 = scmp.ge.s32.totalorder %s549_s12, 2  ;;  %s265_s3 = scalar_lea.sflag [#allocation4], %s264_s30 }
  0xa2   : > { %p374_p0 = pnand %p800_p9, %p799_p8 }
  0xa4   : > { %532 = dma.done.wait (!%p374_p0), %s265_s3, 128  }
  0xa5   : > { %534 = vsyncadd (!%p374_p0), %s265_s3, 4294967168  ;;  %p18_p1 = scmp.ge.s32.totalorder %s594_s15, 4   ;;  %s801_s9 = smov %s541_s10 }
  0xa6   : > { %s802_s10 = smov %s545_s11  ;;  %s803_s11 = smov %s606_s18 }
  0xa7   : > { %s804_s12 = smov %s594_s15  ;;  %20 = sbr.rel (!%p18_p1) target bundleno = 7 (0x7), region = 86 }
  0xae   :  { %270 = vsyncpa [#allocation3], 1 }
  0xaf   :  { %272 = vsyncpa [#allocation3 + $0x1], 1 }
  0xb0   :  { %273 = vsyncpa [#allocation6], 1 }
  0xb1   :  { %275 = vsyncpa [#allocation6 + $0x1], 1 }
  0xb2   :  { %276 = vsyncpa [#allocation4], 1 }
  0xb3   :  { %278 = vsyncpa [#allocation4 + $0x1], 1 }

</bundles_post_ra>
